<compile_context>
chip_gen: v7x
topology: tpu7x:2x2x1
jax: 0.10.0
libtpu: 0.0.40
codegen_flags: <defaults>
</compile_context>

<pallas_src>
import functools

import jax
import jax.numpy as jnp
from jax.experimental import pallas as pl
from jax.experimental.pallas import tpu as pltpu


def _locked_dropout_kernel(mask_ref, x_ref, o_ref):
    # mask_ref: (1, tile_f) -- broadcast over sublanes (locked over time).
    # x_ref / o_ref: (tile_t, tile_f).
    o_ref[...] = x_ref[...] * mask_ref[...]


def _round_up(a, b):
    return -(-a // b) * b


def _round_down(a, b):
    return (a // b) * b


def _pick_block_bytes():
    """~8 MiB blocks on v6e/v7x (amortize per-step overhead); ~4 MiB on v5e,
    which is already <4% step overhead at ~820 GB/s and gains nothing more."""
    try:
        kind = jax.devices()[0].device_kind.lower()
    except Exception:
        kind = ""
    if "v5" in kind:
        return 4 * 1024 * 1024
    return 8 * 1024 * 1024


def locked_dropout_mask(key, batch, hidden, dropout, dtype=jnp.float32):
    """Scaled locked-dropout mask of shape (1, batch, hidden).

    Callers that have an adjacent Pallas/XLA kernel should fuse `x * mask`
    there instead of paying this module's extra read+write pass over x.
    NOTE: the 1/(1-p) scale is rounded to `dtype` (matches PyTorch's
    same-dtype behavior; for bf16 and e.g. p=0.3 this differs slightly from
    an f32-mask-then-cast path).
    """
    keep = 1.0 - float(dropout)
    m = jax.random.bernoulli(key, p=keep, shape=(1, batch, hidden)).astype(dtype)
    return m * jnp.asarray(1.0 / keep, dtype=dtype)


@functools.lru_cache(maxsize=None)
def _build_call(T, F, dtype_name, tile_t, tile_f, grid_t, grid_f, vmem_limit):
    dtype = jnp.dtype(dtype_name)

    if grid_f == 1:
        # 1-D grid over time; mask block index is constant -> fetched once and
        # kept resident in VMEM for the whole grid.
        grid = (grid_t,)
        mask_spec = pl.BlockSpec((1, tile_f), lambda t: (0, 0))
        x_spec = pl.BlockSpec((tile_t, tile_f), lambda t: (t, 0))
        dim_sems = ("parallel",)
    else:
        # t innermost so the mask block index is constant across the inner
        # loop (re-fetched only when the f block changes).
        grid = (grid_f, grid_t)
        mask_spec = pl.BlockSpec((1, tile_f), lambda f, t: (0, f))
        x_spec = pl.BlockSpec((tile_t, tile_f), lambda f, t: (t, f))
        dim_sems = ("parallel", "parallel")

    call = pl.pallas_call(
        _locked_dropout_kernel,
        out_shape=jax.ShapeDtypeStruct((T, F), dtype),
        grid_spec=pl.GridSpec(
            grid=grid,
            in_specs=[mask_spec, x_spec],
            out_specs=x_spec,
        ),
        compiler_params=pltpu.CompilerParams(
            # Output tiles are fully independent -> shard across v7x's two
            # TensorCores; neutral on v5e/v6e (single TC).
            dimension_semantics=dim_sems,
            vmem_limit_bytes=vmem_limit,
        ),
        # Write the result in place over the flattened input (input index 1
        # -> output index 0): removes the second T*F HBM allocation / any
        # defensive copy.  The input is an internal reshape temp, never
        # reused by the caller, so donation below is always safe.
        input_output_aliases={1: 0},
    )
    return jax.jit(call, donate_argnums=(1,))


def locked_dropout(x, key, dropout=0.5, training=True, block_bytes=None):
    """LockedDropout forward. x: (T, B, H) == PyTorch (seq_len, batch, hidden)."""
    if not training or not dropout:
        return x

    T, B, H = x.shape
    F = B * H
    dsize = jnp.dtype(x.dtype).itemsize
    sublane = 16 if dsize == 2 else 8  # bf16 packs 2 rows per sublane
    if block_bytes is None:
        block_bytes = _pick_block_bytes()
    block_bytes = max(int(block_bytes), 1 << 20)

    # One scaled Bernoulli(1-p) draw, locked across time; kept in x.dtype so
    # the per-element kernel op is a single native VPU multiply.
    mask = locked_dropout_mask(key, B, H, dropout, dtype=x.dtype).reshape(1, F)

    # Lane-dense layout: sublanes = time tile, lanes = flattened (B*H).
    x2 = x.reshape(T, F)

    # ---- tile selection (pl.cdiv grids; edge blocks handled by Pallas) ----
    # Lanes: keep the full feature extent resident if one sublane-group row
    # fits the block budget (common case -> 1-D grid, resident mask);
    # otherwise split F into 128-lane-aligned tiles.
    if F <= 128 or F * dsize * sublane <= block_bytes:
        tile_f = F
    else:
        cap_f = _round_down(block_bytes // (dsize * sublane), 128)
        tile_f = max(128, min(_round_down(F, 128), cap_f))
    grid_f = pl.cdiv(F, tile_f)

    # Time: fill the block budget, but keep >= ~4 blocks over the parallel
    # grid (>= 2 per v7x TensorCore, and something for the DMA pipeline to
    # overlap) whenever the f axis alone doesn't provide them.
    cap_t = max(sublane, _round_down(block_bytes // (dsize * tile_f), sublane))
    if grid_f < 4:
        cap_t = min(cap_t, max(sublane, _round_up(pl.cdiv(T, 4), sublane)))
    tile_t = T if T <= cap_t else cap_t          # full extent if T fits (exempt
    grid_t = pl.cdiv(T, tile_t)                  # from the sublane rule)

    # 2 double-buffered in-blocks + 2 out-blocks <= 4 * block_bytes, plus a
    # little headroom for the (tiny) mask block and compiler scratch.
    vmem_limit = max(32 * 1024 * 1024, 4 * block_bytes + (8 << 20))

    call = _build_call(T, F, jnp.dtype(x.dtype).name,
                       int(tile_t), int(tile_f), int(grid_t), int(grid_f),
                       int(vmem_limit))
    out2 = call(mask, x2)
    return out2.reshape(T, B, H)


if __name__ == "__main__":
    key = jax.random.PRNGKey(0)
    kx, km, kxb = jax.random.split(key, 3)

    # Small shape consistent with the module: (seq_len, batch, hidden).
    T, B, H = 8, 2, 32
    x = jax.random.normal(kx, (T, B, H), dtype=jnp.float32)
    dropout = 0.5

    out = jax.block_until_ready(locked_dropout(x, km, dropout=dropout, training=True))

    # Sanity: mask values in {0, 1/(1-p)} and identical ("locked") over time.
    scale = 1.0 / (1.0 - dropout)
    ratio = out / jnp.where(x == 0, 1.0, x)
    assert bool(jnp.all((jnp.abs(ratio) < 1e-5) | (jnp.abs(ratio - scale) < 1e-4))), \
        "mask values not in {0, 1/(1-p)}"
    assert bool(jnp.all(jnp.abs(ratio - ratio[0:1]) < 1e-4)), \
        "mask not locked across time axis"

    # Eval mode / dropout == 0 passthrough.
    assert bool(jnp.all(locked_dropout(x, km, dropout=dropout, training=False) == x))
    assert bool(jnp.all(locked_dropout(x, km, dropout=0.0, training=True) == x))

    # Larger case: exercises a multi-step, pipelined, in-place time grid.
    T2, B2, H2 = 64, 4, 256
    xb = jax.random.normal(kxb, (T2, B2, H2), dtype=jnp.float32)
    outb = jax.block_until_ready(locked_dropout(xb, km, dropout=dropout, training=True))
    ratiob = outb / jnp.where(xb == 0, 1.0, xb)
    assert bool(jnp.all((jnp.abs(ratiob) < 1e-5) | (jnp.abs(ratiob - scale) < 1e-4)))
    assert bool(jnp.all(jnp.abs(ratiob - ratiob[0:1]) < 1e-4))

    print("KERNEL_OK")
</pallas_src>

<mosaic_0001>
module attributes {stable_mosaic.version = 11 : i64} {
  func.func @_locked_dropout_kernel(%arg0: i32, %arg1: memref<1x64xf32, #tpu.memory_space<vmem>>, %arg2: memref<8x64xf32, #tpu.memory_space<vmem>>, %arg3: memref<8x64xf32, #tpu.memory_space<vmem>>) attributes {dimension_semantics = [#tpu.dimension_semantics<parallel>], iteration_bounds = array<i64: 1>, scalar_prefetch = 0 : i64, scratch_operands = 0 : i64, tpu.core_type = #tpu.core_type<tc>, window_params = [{pipeline_mode = #tpu.pipeline_mode<synchronous>, transform_indices = @transform_0, window_bounds = array<i64: 1, 64>}, {transform_indices = @transform_1, window_bounds = array<i64: 8, 64>}, {transform_indices = @transform_2, window_bounds = array<i64: 8, 64>}]} {
    %c0 = arith.constant 0 : index
    %c0_0 = arith.constant 0 : index
    %0 = vector.load %arg2[%c0, %c0_0] : memref<8x64xf32, #tpu.memory_space<vmem>>, vector<8x64xf32>
    %c0_1 = arith.constant 0 : index
    %c0_2 = arith.constant 0 : index
    %1 = vector.load %arg1[%c0_1, %c0_2] : memref<1x64xf32, #tpu.memory_space<vmem>>, vector<1x64xf32>
    %2 = vector.broadcast %1 : vector<1x64xf32> to vector<8x64xf32>
    %3 = arith.mulf %0, %2 : vector<8x64xf32>
    %c0_3 = arith.constant 0 : index
    %c0_4 = arith.constant 0 : index
    %4 = vector.load %arg3[%c0_3, %c0_4] : memref<8x64xf32, #tpu.memory_space<vmem>>, vector<8x64xf32>
    tpu.vector_store %arg3[%c0_3, %c0_4], %3 {strides = array<i32>} : memref<8x64xf32, #tpu.memory_space<vmem>>, vector<8x64xf32>,
    return
  }
  func.func @transform_0(%arg0: i32) -> (i32, i32) {
    %c0_i32 = arith.constant 0 : i32
    %c0_i32_0 = arith.constant 0 : i32
    %c0_i32_1 = arith.constant 0 : i32
    return %c0_i32, %c0_i32_0 : i32, i32
  }
  func.func @transform_1(%arg0: i32) -> (i32, i32) {
    %c0_i32 = arith.constant 0 : i32
    %c0_i32_0 = arith.constant 0 : i32
    return %arg0, %c0_i32 : i32, i32
  }
  func.func @transform_2(%arg0: i32) -> (i32, i32) {
    %c0_i32 = arith.constant 0 : i32
    %c0_i32_0 = arith.constant 0 : i32
    return %arg0, %c0_i32 : i32, i32
  }
}

</mosaic_0001>

<bundles_post_ra>
// kernel: tpu_custom_call.1
= control target key start
LH: loop header
LB: loop body
LE: loop exit
PB: predicated region body
PF: predicated region fallthrough
CT: control target
= control target key end

     0   :  { %7 = vsyncpa [#allocation3], 0  ;;  %s193_s0 = inlined_call_operand.hbm [shape: f32[1,64], index: 0, kind: input, shape index: {}]   ;;  %s194_s1 = inlined_call_operand.hbm [shape: f32[8,64], index: 1, kind: input, shape index: {}, may-alias: {1,2}]   ;;  %s195_s2 = inlined_call_operand.hbm [shape: f32[8,64], index: 2, kind: output, shape index: {}, may-alias: {1,2}]  }
   0x1   :  { %8 = vsyncpa [#allocation6], 0 }
   0x2   :  { %9 = vsyncpa [#allocation4], 0  ;;  %s139_s9 = smov [#allocation2]   ;;  %s140_s11 = smov [#allocation5]  }
   0x3   :  { %s16_s10 = sshll.u32 %s139_s9, 4  ;;  %s26_s12 = sshll.u32 %s140_s11, 4  ;;  %s17_s10 = int_to_ptr.vmem [resolvable:$true] %s16_s10  ;;  %s27_s12 = int_to_ptr.vmem [resolvable:$true] %s26_s12 }
   0x4   :  { %s67_s15 = scalar_lea.hbm %s193_s0, 16 }
   0x5   :  { %p68_p0 = scmp.ne.s32.totalorder %s193_s0, %s67_s15  ;;  %p71_p1 = scmp.lt.u32.totalorder %s67_s15, %s193_s0 }
   0x7   :  { %p73_p2 = pnand %p71_p1, %p68_p0 }
   0x9   :  { %76 = shalt.err (!%p73_p2)
}
   0xa   :  { %s77_s20 = scalar_lea.vmem %s17_s10, 16  ;;  %s81_s21 = scalar_lea.vmem %s17_s10, 32 }
   0xb   :  { %p78_p3 = scmp.ne.s32.totalorder %s17_s10, %s77_s20  ;;  %p82_p4 = scmp.lt.s32.totalorder %s17_s10, %s17_s10 }
   0xc   :  { %p83_p5 = scmp.lt.s32.totalorder %s81_s21, %s77_s20 }
   0xe   :  { %p84_p6 = por %p83_p5, %p82_p4 }
  0x10   :  { %p85_p7 = pnand %p84_p6, %p78_p3 }
  0x12   :  { %88 = shalt.err (!%p85_p7)
}
  0x13   :  { %19 = dma.hbm_to_vmem [thread:$0]  %s193_s0, 16, %s17_s10, [#allocation3]  }
  0x14   :  { %s89_s26 = scalar_lea.hbm %s194_s1, 128 }
  0x15   :  { %p90_p8 = scmp.ne.s32.totalorder %s194_s1, %s89_s26  ;;  %p93_p9 = scmp.lt.u32.totalorder %s89_s26, %s194_s1 }
  0x17   :  { %p95_p10 = pnand %p93_p9, %p90_p8 }
  0x19   :  { %98 = shalt.err (!%p95_p10)
}
  0x1a   :  { %s99_s3 = scalar_lea.vmem %s27_s12, 128  ;;  %p104_p12 = scmp.lt.s32.totalorder %s27_s12, %s27_s12 }
  0x1b   :  { %p100_p11 = scmp.ne.s32.totalorder %s27_s12, %s99_s3  ;;  %p105_p13 = scmp.lt.s32.totalorder %s99_s3, %s99_s3 }
  0x1d   :  { %p106_p0 = por %p105_p13, %p104_p12 }
  0x1f   :  { %p107_p1 = pnand %p106_p0, %p100_p11 }
  0x21   :  { %110 = shalt.err (!%p107_p1)
}
  0x22   :  { %29 = dma.hbm_to_vmem [thread:$0]  %s194_s1, 128, %s27_s12, [#allocation6]  }
  0x23   :  { %133 = dma.done.wait [#allocation3], 16  }
  0x24   :  { %134 = vsyncadd [#allocation3], 4294967280 }
  0x25   :  { %135 = dma.done.wait [#allocation6], 128  }
  0x26   :  { %136 = vsyncadd [#allocation6], 4294967168  ;;  %s141_s5 = smov [#allocation7]   ;;  %v36_v0 = vld [vmem:[#allocation5] sm:$0xff]  ;;  %v63_v1 = vld [vmem:[#allocation2] ss:$0 sm:$0xff] }
  0x27   :  { %s53_s6 = sshll.u32 %s141_s5, 4  ;;  %vm45_vm0 = vcmask 523264   ;;  %v44_v2 = vmul.f32 %v63_v1, %v36_v0  ;;  %s54_s6 = int_to_ptr.vmem [resolvable:$true] %s53_s6 }
  0x28   :  { %s111_s7 = scalar_lea.vmem %s54_s6, 128  ;;  %p116_p3 = scmp.lt.s32.totalorder %s54_s6, %s54_s6 }
  0x29   :  { %46 = vst.msk [vmem:[#allocation7] sm:$0xff] %vm45_vm0, %v44_v2  ;;  %p112_p2 = scmp.ne.s32.totalorder %s54_s6, %s111_s7  ;;  %p117_p4 = scmp.lt.s32.totalorder %s111_s7, %s111_s7 }
  0x2b   :  { %p118_p5 = por %p117_p4, %p116_p3 }
  0x2d   :  { %p119_p6 = pnand %p118_p5, %p112_p2 }
  0x2f   :  { %122 = shalt.err (!%p119_p6)
}
  0x30   :  { %s123_s9 = scalar_lea.hbm %s195_s2, 128 }
  0x31   :  { %p124_p7 = scmp.ne.s32.totalorder %s195_s2, %s123_s9  ;;  %p127_p8 = scmp.lt.u32.totalorder %s123_s9, %s195_s2 }
  0x33   :  { %p129_p9 = pnand %p127_p8, %p124_p7 }
  0x35   :  { %132 = shalt.err (!%p129_p9)
}
  0x36   :  { %56 = dma.vmem_to_hbm [thread:$0]  %s54_s6, 128, %s195_s2, [#allocation4]  }
  0x37   :  { %137 = dma.done.wait [#allocation4], 128  }
  0x38   :  { %138 = vsyncadd [#allocation4], 4294967168 }
  0x39   :  { %60 = vsyncpa [#allocation3], 1 }
  0x3a   :  { %61 = vsyncpa [#allocation6], 1 }
  0x3b   :  { %62 = vsyncpa [#allocation4], 1 }

</bundles_post_ra>
